<compile_context>
chip_gen: v5e
topology: v5e:2x2
jax: 0.10.0
libtpu: 0.0.40
codegen_flags: <defaults>
</compile_context>

<pallas_src>
import jax
import jax.numpy as jnp
from jax import lax
from jax.experimental import pallas as pl
from jax.experimental.pallas import tpu as pltpu


def _round_up(x, m):
    return (x + m - 1) // m * m


def _zinb_decoder_kernel(vec_ref, sz_ref, ge_ref, w_ref, b_ref, out_ref):
    v = vec_ref[...]                     # [tile_n, D]  float32
    wt = w_ref[...]                      # [3, D]       combined head weights
    b = b_ref[...]                       # [3, 1]       combined head biases

    # [3, tile_n] logits: contract D of both operands so N stays on lanes.
    logits = lax.dot_general(
        wt, v, (((1,), (1,)), ((), ())),
        preferred_element_type=jnp.float32) + b

    sz = sz_ref[...]                     # [1, tile_n]
    ge = ge_ref[...]                     # [1, tile_n]

    # dec_mean: Linear -> Sigmoid ; MeanAct(ge * mu_) scaled by sz
    mu_sig = jax.nn.sigmoid(logits[0:1, :])
    mu = sz * jnp.clip(jnp.exp(ge * mu_sig) - 1.0, 1e-5, 1e6)
    # dec_disp: Linear ; DispAct(ge * disp_) = clamp(softplus(.), 1e-4, 1e4)
    disp = jnp.clip(jax.nn.softplus(ge * logits[1:2, :]), 1e-4, 1e4)
    # dec_pi: Linear -> Sigmoid
    pi = jax.nn.sigmoid(logits[2:3, :])

    out_ref[0:1, :] = mu
    out_ref[1:2, :] = disp
    out_ref[2:3, :] = pi


def combine_params(params):
    """Build the fused [3, D] weight / [3, 1] bias ONCE (hoisted out of the
    per-call path)."""
    w_mean, b_mean = params["mean"]      # [D, 1], [1]
    w_disp, b_disp = params["disp"]
    w_pi, b_pi = params["pi"]
    w_t = jnp.concatenate([w_mean, w_disp, w_pi], axis=1).T.astype(jnp.float32)  # [3, D]
    b = jnp.concatenate([b_mean, b_disp, b_pi]).reshape(3, 1).astype(jnp.float32)
    return w_t, b


def zinb_decoder(vector, sz_factor, ge_factor, w_comb_t, b_comb, *, tile_n=1024):
    """vector: [N, D] f32, sz_factor / ge_factor: [N, 1] f32.
    w_comb_t: [3, D], b_comb: [3, 1]  (from combine_params).
    Returns (mu, disp, pi), each [N, 1] f32."""
    N, D = vector.shape

    # Lane-dense tiling: tile_n is a multiple of 128, capped near N for tiny
    # problems; N is zero-padded to a multiple of tile_n (padded rows produce
    # finite values and are sliced off below).
    tile_n = max(128, min(_round_up(int(tile_n), 128), _round_up(N, 128)))
    n_pad = _round_up(N, tile_n)
    if n_pad != N:
        pad = n_pad - N
        vector = jnp.pad(vector, ((0, pad), (0, 0)))
        sz_factor = jnp.pad(sz_factor, ((0, pad), (0, 0)))
        ge_factor = jnp.pad(ge_factor, ((0, pad), (0, 0)))

    vector = vector.astype(jnp.float32)
    sz_row = sz_factor.astype(jnp.float32).reshape(1, n_pad)   # N on lanes
    ge_row = ge_factor.astype(jnp.float32).reshape(1, n_pad)

    grid = (n_pad // tile_n,)

    out = pl.pallas_call(
        _zinb_decoder_kernel,
        out_shape=jax.ShapeDtypeStruct((3, n_pad), jnp.float32),
        grid_spec=pltpu.PrefetchScalarGridSpec(
            num_scalar_prefetch=0,
            grid=grid,
            in_specs=[
                pl.BlockSpec((tile_n, D), lambda i: (i, 0)),   # vector tile
                pl.BlockSpec((1, tile_n), lambda i: (0, i)),   # sz_factor row tile
                pl.BlockSpec((1, tile_n), lambda i: (0, i)),   # ge_factor row tile
                pl.BlockSpec((3, D), lambda i: (0, 0)),        # fused weight (resident)
                pl.BlockSpec((3, 1), lambda i: (0, 0)),        # fused bias (resident)
            ],
            out_specs=pl.BlockSpec((3, tile_n), lambda i: (0, i)),  # lane-dense output
        ),
        compiler_params=pltpu.CompilerParams(
            dimension_semantics=("parallel",)),
    )(vector, sz_row, ge_row, w_comb_t, b_comb)

    mu = out[0, :N].reshape(N, 1)
    disp = out[1, :N].reshape(N, 1)
    pi = out[2, :N].reshape(N, 1)
    return mu, disp, pi


def _init_linear(key, fan_in):
    """Deterministic init matching nn.Linear's U(-1/sqrt(fan_in), 1/sqrt(fan_in))."""
    kw, kb = jax.random.split(key)
    bound = 1.0 / jnp.sqrt(float(fan_in))
    w = jax.random.uniform(kw, (fan_in, 1), jnp.float32, -bound, bound)
    b = jax.random.uniform(kb, (1,), jnp.float32, -bound, bound)
    return w, b


def _reference(vector, sz_factor, ge_factor, params):
    wm, bm = params["mean"]
    wd, bd = params["disp"]
    wp, bp = params["pi"]
    mu_sig = jax.nn.sigmoid(vector @ wm + bm)
    disp_lin = vector @ wd + bd
    pi = jax.nn.sigmoid(vector @ wp + bp)
    mu = sz_factor * jnp.clip(jnp.exp(ge_factor * mu_sig) - 1.0, 1e-5, 1e6)
    disp = jnp.clip(jax.nn.softplus(ge_factor * disp_lin), 1e-4, 1e4)
    return mu, disp, pi


def _check(vector, sz, ge, params, w_t, b, tile_n):
    mu, disp, pi = zinb_decoder(vector, sz, ge, w_t, b, tile_n=tile_n)
    jax.block_until_ready((mu, disp, pi))
    mu_r, disp_r, pi_r = _reference(vector, sz, ge, params)
    assert jnp.allclose(mu, mu_r, atol=1e-5, rtol=1e-5)
    assert jnp.allclose(disp, disp_r, atol=1e-5, rtol=1e-5)
    assert jnp.allclose(pi, pi_r, atol=1e-5, rtol=1e-5)


if __name__ == "__main__":
    feats_dim = 24            # small feature dim for the test
    key = jax.random.PRNGKey(0)
    k_vec, k_sz, k_ge, k_m, k_d, k_p, k_vec2, k_sz2, k_ge2 = jax.random.split(key, 9)

    params = {
        "mean": _init_linear(k_m, feats_dim),
        "disp": _init_linear(k_d, feats_dim),
        "pi": _init_linear(k_p, feats_dim),
    }
    w_t, b = combine_params(params)      # built once, reused across calls

    # Small test: N=16 (single padded tile).
    N = 16
    vector = jax.random.normal(k_vec, (N, feats_dim), jnp.float32)
    sz_factor = jax.random.uniform(k_sz, (N, 1), jnp.float32, 0.5, 2.0)
    ge_factor = jax.random.uniform(k_ge, (N, 1), jnp.float32, 0.5, 2.0)
    _check(vector, sz_factor, ge_factor, params, w_t, b, tile_n=1024)

    # Multi-tile test: N=300 with tile_n=128 exercises padding + grid>1.
    N2 = 300
    vector2 = jax.random.normal(k_vec2, (N2, feats_dim), jnp.float32)
    sz2 = jax.random.uniform(k_sz2, (N2, 1), jnp.float32, 0.5, 2.0)
    ge2 = jax.random.uniform(k_ge2, (N2, 1), jnp.float32, 0.5, 2.0)
    _check(vector2, sz2, ge2, params, w_t, b, tile_n=128)

    print("KERNEL_OK")
</pallas_src>

<mosaic_0001>
module attributes {stable_mosaic.version = 11 : i64} {
  func.func @_zinb_decoder_kernel(%arg0: i32, %arg1: memref<128x24xf32, #tpu.memory_space<vmem>>, %arg2: memref<1x128xf32, #tpu.memory_space<vmem>>, %arg3: memref<1x128xf32, #tpu.memory_space<vmem>>, %arg4: memref<3x24xf32, #tpu.memory_space<vmem>>, %arg5: memref<3x1xf32, #tpu.memory_space<vmem>>, %arg6: memref<3x128xf32, #tpu.memory_space<vmem>>) attributes {dimension_semantics = [#tpu.dimension_semantics<parallel>], iteration_bounds = array<i64: 1>, scalar_prefetch = 0 : i64, scratch_operands = 0 : i64, tpu.core_type = #tpu.core_type<tc>, window_params = [{transform_indices = @transform_0, window_bounds = array<i64: 128, 24>}, {transform_indices = @transform_1, window_bounds = array<i64: 1, 128>}, {transform_indices = @transform_2, window_bounds = array<i64: 1, 128>}, {pipeline_mode = #tpu.pipeline_mode<synchronous>, transform_indices = @transform_3, window_bounds = array<i64: 3, 24>}, {pipeline_mode = #tpu.pipeline_mode<synchronous>, transform_indices = @transform_4, window_bounds = array<i64: 3, 1>}, {transform_indices = @transform_5, window_bounds = array<i64: 3, 128>}]} {
    %c0 = arith.constant 0 : index
    %c0_0 = arith.constant 0 : index
    %0 = vector.load %arg1[%c0, %c0_0] : memref<128x24xf32, #tpu.memory_space<vmem>>, vector<128x24xf32>
    %c0_1 = arith.constant 0 : index
    %c0_2 = arith.constant 0 : index
    %1 = vector.load %arg4[%c0_1, %c0_2] : memref<3x24xf32, #tpu.memory_space<vmem>>, vector<3x24xf32>
    %c0_3 = arith.constant 0 : index
    %c0_4 = arith.constant 0 : index
    %2 = vector.load %arg5[%c0_3, %c0_4] : memref<3x1xf32, #tpu.memory_space<vmem>>, vector<3x1xf32>
    %cst = arith.constant dense<0.000000e+00> : vector<3x128xf32>
    %3 = tpu.matmul %1, %0, %cst {dimension_numbers = #tpu.dot_dimension_numbers<[1], [1], [0], [0], [0, 0, 1, 0], [], []>} : vector<3x24xf32>, vector<128x24xf32>, vector<3x128xf32> -> vector<3x128xf32>
    %4 = vector.broadcast %2 : vector<3x1xf32> to vector<3x128xf32>
    %5 = arith.addf %3, %4 : vector<3x128xf32>
    %c0_5 = arith.constant 0 : index
    %c0_6 = arith.constant 0 : index
    %6 = vector.load %arg2[%c0_5, %c0_6] : memref<1x128xf32, #tpu.memory_space<vmem>>, vector<1x128xf32>
    %c0_7 = arith.constant 0 : index
    %c0_8 = arith.constant 0 : index
    %7 = vector.load %arg3[%c0_7, %c0_8] : memref<1x128xf32, #tpu.memory_space<vmem>>, vector<1x128xf32>
    %8 = vector.extract_strided_slice %5 {offsets = [0, 0], sizes = [1, 128], strides = [1, 1]} : vector<3x128xf32> to vector<1x128xf32>
    %9 = arith.negf %8 : vector<1x128xf32>
    %10 = math.exp %9 : vector<1x128xf32>
    %cst_9 = arith.constant 1.000000e+00 : f32
    %11 = vector.broadcast %cst_9 : f32 to vector<1x128xf32>
    %12 = arith.addf %11, %10 : vector<1x128xf32>
    %13 = arith.divf %11, %12 : vector<1x128xf32>
    %14 = arith.mulf %7, %13 : vector<1x128xf32>
    %15 = math.exp %14 : vector<1x128xf32>
    %cst_10 = arith.constant 1.000000e+00 : f32
    %16 = vector.broadcast %cst_10 : f32 to vector<1x128xf32>
    %17 = arith.subf %15, %16 : vector<1x128xf32>
    %cst_11 = arith.constant 9.99999974E-6 : f32
    %cst_12 = arith.constant 1.000000e+06 : f32
    %18 = vector.broadcast %cst_11 : f32 to vector<1x128xf32>
    %19 = arith.maximumf %18, %17 : vector<1x128xf32>
    %20 = vector.broadcast %cst_12 : f32 to vector<1x128xf32>
    %21 = arith.minimumf %20, %19 : vector<1x128xf32>
    %22 = arith.mulf %6, %21 : vector<1x128xf32>
    %23 = vector.extract_strided_slice %5 {offsets = [1, 0], sizes = [1, 128], strides = [1, 1]} : vector<3x128xf32> to vector<1x128xf32>
    %24 = arith.mulf %7, %23 : vector<1x128xf32>
    %cst_13 = arith.constant 0.000000e+00 : f32
    %25 = vector.broadcast %cst_13 : f32 to vector<1x128xf32>
    %26 = arith.maximumf %24, %25 : vector<1x128xf32>
    %27 = vector.broadcast %cst_13 : f32 to vector<1x128xf32>
    %28 = arith.subf %24, %27 : vector<1x128xf32>
    %29 = arith.cmpf one, %28, %28 : vector<1x128xf32>
    %30 = vector.broadcast %cst_13 : f32 to vector<1x128xf32>
    %31 = arith.addf %24, %30 : vector<1x128xf32>
    %32 = math.absf %28 : vector<1x128xf32>
    %cst_14 = arith.constant 0.000000e+00 : f32
    %33 = vector.broadcast %cst_14 : f32 to vector<1x128xf32>
    %34 = arith.subf %33, %32 : vector<1x128xf32>
    %35 = math.exp %34 : vector<1x128xf32>
    %36 = math.log1p %35 : vector<1x128xf32>
    %37 = arith.addf %26, %36 : vector<1x128xf32>
    %38 = arith.select %29, %31, %37 : vector<1x128xi1>, vector<1x128xf32>
    %cst_15 = arith.constant 9.99999974E-5 : f32
    %cst_16 = arith.constant 1.000000e+04 : f32
    %39 = vector.broadcast %cst_15 : f32 to vector<1x128xf32>
    %40 = arith.maximumf %39, %38 : vector<1x128xf32>
    %41 = vector.broadcast %cst_16 : f32 to vector<1x128xf32>
    %42 = arith.minimumf %41, %40 : vector<1x128xf32>
    %43 = vector.extract_strided_slice %5 {offsets = [2, 0], sizes = [1, 128], strides = [1, 1]} : vector<3x128xf32> to vector<1x128xf32>
    %44 = arith.negf %43 : vector<1x128xf32>
    %45 = math.exp %44 : vector<1x128xf32>
    %cst_17 = arith.constant 1.000000e+00 : f32
    %46 = vector.broadcast %cst_17 : f32 to vector<1x128xf32>
    %47 = arith.addf %46, %45 : vector<1x128xf32>
    %48 = arith.divf %46, %47 : vector<1x128xf32>
    %c0_18 = arith.constant 0 : index
    %c0_19 = arith.constant 0 : index
    %49 = vector.load %arg6[%c0_18, %c0_19] : memref<3x128xf32, #tpu.memory_space<vmem>>, vector<1x128xf32>
    tpu.vector_store %arg6[%c0_18, %c0_19], %22 {strides = array<i32>} : memref<3x128xf32, #tpu.memory_space<vmem>>, vector<1x128xf32>,
    %c1 = arith.constant 1 : index
    %c0_20 = arith.constant 0 : index
    %50 = vector.load %arg6[%c1, %c0_20] : memref<3x128xf32, #tpu.memory_space<vmem>>, vector<1x128xf32>
    tpu.vector_store %arg6[%c1, %c0_20], %42 {strides = array<i32>} : memref<3x128xf32, #tpu.memory_space<vmem>>, vector<1x128xf32>,
    %c2 = arith.constant 2 : index
    %c0_21 = arith.constant 0 : index
    %51 = vector.load %arg6[%c2, %c0_21] : memref<3x128xf32, #tpu.memory_space<vmem>>, vector<1x128xf32>
    tpu.vector_store %arg6[%c2, %c0_21], %48 {strides = array<i32>} : memref<3x128xf32, #tpu.memory_space<vmem>>, vector<1x128xf32>,
    return
  }
  func.func @transform_0(%arg0: i32) -> (i32, i32) {
    %c0_i32 = arith.constant 0 : i32
    %c0_i32_0 = arith.constant 0 : i32
    return %arg0, %c0_i32 : i32, i32
  }
  func.func @transform_1(%arg0: i32) -> (i32, i32) {
    %c0_i32 = arith.constant 0 : i32
    %c0_i32_0 = arith.constant 0 : i32
    return %c0_i32, %arg0 : i32, i32
  }
  func.func @transform_2(%arg0: i32) -> (i32, i32) {
    %c0_i32 = arith.constant 0 : i32
    %c0_i32_0 = arith.constant 0 : i32
    return %c0_i32, %arg0 : i32, i32
  }
  func.func @transform_3(%arg0: i32) -> (i32, i32) {
    %c0_i32 = arith.constant 0 : i32
    %c0_i32_0 = arith.constant 0 : i32
    %c0_i32_1 = arith.constant 0 : i32
    return %c0_i32, %c0_i32_0 : i32, i32
  }
  func.func @transform_4(%arg0: i32) -> (i32, i32) {
    %c0_i32 = arith.constant 0 : i32
    %c0_i32_0 = arith.constant 0 : i32
    %c0_i32_1 = arith.constant 0 : i32
    return %c0_i32, %c0_i32_0 : i32, i32
  }
  func.func @transform_5(%arg0: i32) -> (i32, i32) {
    %c0_i32 = arith.constant 0 : i32
    %c0_i32_0 = arith.constant 0 : i32
    return %c0_i32, %arg0 : i32, i32
  }
}

</mosaic_0001>

<bundles_post_ra>
// kernel: tpu_custom_call.1
= control target key start
LH: loop header
LB: loop body
LE: loop exit
PB: predicated region body
PF: predicated region fallthrough
CT: control target
= control target key end

     0   :  { %vm44_vm0 = vcmask 195584   ;;  %s359_s0 = inlined_call_operand.vmem [shape: f32[128,24], index: 0, kind: input, shape index: {}]   ;;  %s360_s1 = inlined_call_operand.vmem [shape: f32[1,128], index: 1, kind: input, shape index: {}]   ;;  %s361_s2 = inlined_call_operand.vmem [shape: f32[1,128], index: 2, kind: input, shape index: {}]   ;;  %s362_s3 = inlined_call_operand.vmem [shape: f32[3,24], index: 3, kind: input, shape index: {}]   ;;  %s363_s4 = inlined_call_operand.vmem [shape: f32[3,1], index: 4, kind: input, shape index: {}]   ;;  %s364_s5 = inlined_call_operand.hbm [shape: f32[3,128], index: 5, kind: output, shape index: {}]  }
   0x1   :  { %v36_v0 = vld [vmem:[%s359_s0 + $0x78] sm:$0xff]  ;;  %v35_v1 = vld [vmem:[%s359_s0 + $0x70] sm:$0xff] }
   0x2   :  { %189 = vmatpush.xpose.msk.msra.mxu0 %vm44_vm0, %v36_v0 }
   0x3   :  { %10 = vsyncpa [#allocation3], 0  ;;  %v34_v2 = vld [vmem:[%s359_s0 + $0x68] sm:$0xff]  ;;  %v33_v3 = vld [vmem:[%s359_s0 + $0x60] sm:$0xff]  ;;  %v247_v10 = vmov 0   ;;  %s180_s8 = sshll.u32 %s364_s5, 4  ;;  %s181_s8 = int_to_ptr.hbm [resolvable:$true] %s180_s8 }
   0x4   :  { %v32_v4 = vld [vmem:[%s359_s0 + $0x58] sm:$0xff]  ;;  %v31_v5 = vld [vmem:[%s359_s0 + $0x50] sm:$0xff]  ;;  %v30_v6 = vld [vmem:[%s359_s0 + $0x48] sm:$0xff]  ;;  %210 = vset.pattern.permute.xlu0 %v247_v10 }
   0x5   :  { %v29_v7 = vld [vmem:[%s359_s0 + $0x40] sm:$0xff]  ;;  %v28_v8 = vld [vmem:[%s359_s0 + $0x38] sm:$0xff]  ;;  %v27_v11 = vld [vmem:[%s359_s0 + $0x30] sm:$0xff] }
   0x6   :  { %190 = vmatpush.xpose.msk.msra.mxu0 %vm44_vm0, %v35_v1  ;;  %v38_v9 = vld [vmem:[%s363_s4] sm:$0x7]  ;;  %v26_v12 = vld [vmem:[%s359_s0 + $0x28] sm:$0xff]  ;;  %v24_v14 = vld [vmem:[%s359_s0 + $0x18] sm:$0xff] }
   0x7   :  { %41 = vperm.xlu0 %210, %v38_v9   ;;  %v25_v13 = vld [vmem:[%s359_s0 + $0x20] sm:$0xff]  ;;  %v23_v15 = vld [vmem:[%s359_s0 + $0x10] sm:$0xff]  ;;  %v22_v16 = vld [vmem:[%s359_s0 + $0x8] sm:$0xff] }
   0x8   :  { %v21_v17 = vld [vmem:[%s359_s0] sm:$0xff] }
   0x9   :  { %v37_v18 = vld [vmem:[%s362_s3] sm:$0x7]  ;;  %s248_s3 = smov [#allocation2]  }
   0xa   :  { %191 = vmatpush.xpose.msk.msra.mxu0 %vm44_vm0, %v34_v2  ;;  %v117_v23 = vld [vmem:[%s361_s2] sm:$0x1]  ;;  %s178_s30 = sshll.u32 %s248_s3, 4  ;;  %s179_s30 = int_to_ptr.vmem [resolvable:$true] %s178_s30 }
   0xb   :  { %v116_v60 = vld [vmem:[%s360_s1] sm:$0x1] }
   0xe   :  { %192 = vmatpush.xpose.msk.msra.mxu0 %vm44_vm0, %v33_v3 }
  0x12   :  { %193 = vmatpush.xpose.msk.msra.mxu0 %vm44_vm0, %v32_v4 }
  0x16   :  { %194 = vmatpush.xpose.msk.msra.mxu0 %vm44_vm0, %v31_v5 }
  0x1a   :  { %195 = vmatpush.xpose.msk.msra.mxu0 %vm44_vm0, %v30_v6 }
  0x1e   :  { %196 = vmatpush.xpose.msk.msra.mxu0 %vm44_vm0, %v29_v7 }
  0x22   :  { %197 = vmatpush.xpose.msk.msra.mxu0 %vm44_vm0, %v28_v8 }
  0x26   :  { %198 = vmatpush.xpose.msk.msra.mxu0 %vm44_vm0, %v27_v11 }
  0x2a   :  { %199 = vmatpush.xpose.msk.msra.mxu0 %vm44_vm0, %v26_v12 }
  0x2e   :  { %200 = vmatpush.xpose.msk.msra.mxu0 %vm44_vm0, %v25_v13 }
  0x32   :  { %201 = vmatpush.xpose.msk.msra.mxu0 %vm44_vm0, %v24_v14 }
  0x36   :  { %202 = vmatpush.xpose.msk.msra.mxu0 %vm44_vm0, %v23_v15 }
  0x3a   :  { %203 = vmatpush.xpose.msk.msra.mxu0 %vm44_vm0, %v22_v16 }
  0x3e   :  { %204 = vmatpush.xpose.msk.msra.mxu0 %vm44_vm0, %v21_v17 }
  0x41   :  { %205 = vmatmul.msk.f32.vlgmr.msra.gmra.mxu0 %vm44_vm0, %v37_v18 }
  0x79   :  { %v42_v19 = vpop.permute.xlu0 %41 }
  0xbe   :  { %v113_v20 = vpop.f32.mrf.mxu0 }
  0xbf   :  { %v114_v21 = vadd.f32 %v113_v20, %v42_v19 }
  0xc1   :  { %v206_v22 = vmul.f32 -1.442695, %v114_v21  ;;  %145 = vst [vmem:[#allocation1] sm:$0xff] %v114_v21 }
  0xc3   :  { %211 = vpow2.f32 %v206_v22 }
  0xc8   :  { %v147_v24 = vld [vmem:[#allocation1 + $0x1] ss:$9 sm:$0xff] }
  0xc9   :  { %v212_v25 = vpop.eup %211  ;;  %v149_v26 = vmul.f32 %v147_v24, %v117_v23 }
  0xca   :  { %v121_v27 = vadd.f32 1.0, %v212_v25 }
  0xcb   :  { %v153_v28 = vand.u32 2147483647, %v149_v26  ;;  %v150_v51 = vmax.f32 %v149_v26, 0.0  ;;  %vm151_vm6 = vcmp.ne.f32.partialorder %v149_v26, %v149_v26 }
  0xcc   :  { %213 = vrcp.f32 %v121_v27  ;;  %v133_v34 = vand.u32 2147483648, %v121_v27  ;;  %v131_v37 = vand.u32 2147483647, %v121_v27  ;;  %vm127_vm2 = vweird.f32 %v121_v27 }
  0xcd   :  { %v154_v29 = vsub.f32 0.0, %v153_v28 }
  0xce   :  { %v134_v41 = vor.u32 1.1754944e-38, %v133_v34  ;;  %vm132_vm4 = vcmp.eq.f32.partialorder %v131_v37, 8.507059e+37 }
  0xcf   :  { %v155_v30 = vmul.f32 1.442695, %v154_v29 }
  0xd1   :  { %215 = vpow2.f32 %v155_v30 }
  0xd2   :  { %v214_v31 = vpop.eup %213 }
  0xd3   :  { %v123_v32 = vmul.f32 %v214_v31, %v121_v27  ;;  %vm128_vm1 = vweird.f32 %v214_v31 }
  0xd4   :  { %vm129_vm3 = vmor %vm127_vm2, %vm128_vm1 }
  0xd5   :  { %v124_v33 = vsub.f32 1.0, %v123_v32 }
  0xd7   :  { %v216_v35 = vpop.eup %215  ;;  %v125_v36 = vmul.f32 %v214_v31, %v124_v33 }
  0xd8   :  { %v157_v38 = vadd.f32 1.0, %v216_v35  ;;  %v160_v40 = vmul.f32 -0.5, %v216_v35  ;;  %v163_v46 = vand.u32 2147483647, %v216_v35 }
  0xd9   :  { %v126_v39 = vadd.f32 %v214_v31, %v125_v36 }
  0xda   :  { %217 = vlog2.f32 %v157_v38  ;;  %v161_v45 = vadd.f32 1.0, %v160_v40  ;;  %vm164_vm5 = vcmp.lt.f32.partialorder %v163_v46, 0.0004427343 }
  0xdb   :  { %v130_v42 = vsel %vm129_vm3, %v214_v31, %v126_v39 }
  0xdc   :  { %v135_v43 = vsel %vm132_vm4, %v134_v41, %v130_v42  ;;  %v162_v50 = vmul.f32 %v216_v35, %v161_v45 }
  0xdd   :  { %v137_v44 = vmul.f32 %v135_v43, %v117_v23  ;;  %172 = vst [vmem:[#allocation2] sm:$0x4] %v135_v43 }
  0xdf   :  { %v138_v47 = vmul.f32 1.442695, %v137_v44 }
  0xe0   :  { %v218_v48 = vpop.eup %217 }
  0xe1   :  { %219 = vpow2.f32 %v138_v47  ;;  %v159_v49 = vmul.f32 0.6931472, %v218_v48 }
  0xe3   :  { %v165_v52 = vsel %vm164_vm5, %v162_v50, %v159_v49 }
  0xe4   :  { %v166_v53 = vadd.f32 %v165_v52, %v150_v51 }
  0xe6   :  { %v167_v54 = vsel %vm151_vm6, %v149_v26, %v166_v53 }
  0xe7   :  { %v220_v55 = vpop.eup %219  ;;  %v168_v56 = vmax.f32 %v167_v54, 0.0001 }
  0xe8   :  { %v207_v57 = vadd.f32 -1.0, %v220_v55 }
  0xe9   :  { %v169_v58 = vmin.f32 %v168_v56, 10000.0 }
  0xea   :  { %v141_v59 = vmax.f32 %v207_v57, 1e-05 }
  0xeb   :  { %171 = vst [vmem:[#allocation2 + $0x1] sm:$0x1] %v169_v58 }
  0xec   :  { %v142_v61 = vmin.f32 %v141_v59, 1000000.0 }
  0xee   :  { %v143_v62 = vmul.f32 %v142_v61, %v116_v60 }
  0xf0   :  { %170 = vst [vmem:[#allocation2] sm:$0x1] %v143_v62 }
  0xf1   :  { %183 = dma.vmem_to_hbm [thread:$0]  %s179_s30, 64, %s181_s8, [#allocation3]  }
  0xf2   :  { %245 = dma.done.wait [#allocation3], 64  }
  0xf3   :  { %246 = vsyncadd [#allocation3], 4294967232 }
  0xf4   :  { %188 = vsyncpa [#allocation3], 1 }

</bundles_post_ra>
